<compile_context>
chip_gen: v7x
topology: tpu7x:2x2x1
jax: 0.10.0
libtpu: 0.0.40
codegen_flags: <defaults>
</compile_context>

<pallas_src>
import functools
import math

import jax
import jax.numpy as jnp
from jax.experimental import pallas as pl
from jax.experimental.pallas import tpu as pltpu


def _attention_kernel(x_ref, wq_ref, bq_ref, wk_ref, bk_ref, wv_ref, bv_ref,
                      wo_ref, bo_ref, *out_refs, num_heads, head_dim, vis):
    """One batch tile per grid step.

    x_ref:     (bb, S, H)        input hidden states (bb = batch tile)
    w*_ref:    (H, H) bf16       projection weights, layout [in, out]
    b*_ref:    (1, H) f32        projection biases
    out_refs:  (bb, S, H) output [+ (bb, nh, S, S) attention probs if vis]
    """
    out_ref = out_refs[0]
    probs_ref = out_refs[1] if vis else None

    bb, S, H = x_ref.shape

    # ---- fused Q/K/V projections: one big MXU matmul each over bb*S tokens,
    #      bf16 operands, f32 accumulation, f32 bias add. ----
    x2 = x_ref[...].reshape(bb * S, H).astype(jnp.bfloat16)          # [bb*S, H]

    q = jnp.dot(x2, wq_ref[...], preferred_element_type=jnp.float32) + bq_ref[0]
    k = jnp.dot(x2, wk_ref[...], preferred_element_type=jnp.float32) + bk_ref[0]
    v = jnp.dot(x2, wv_ref[...], preferred_element_type=jnp.float32) + bv_ref[0]

    # Fold the softmax scale into q once: O(bb*S*H) instead of O(bb*nh*S^2).
    q = q * (1.0 / math.sqrt(head_dim))

    q3 = q.reshape(bb, S, H)
    k3 = k.reshape(bb, S, H)
    v3 = v.reshape(bb, S, H)

    def split_heads(t3):
        # [bb, S, H] -> [bb*nh, S, hd] with batch index = b*nh + h (b-major),
        # so the probs / ctx results reshape straight back to (bb, nh, ...).
        slabs = [t3[b:b + 1, :, h * head_dim:(h + 1) * head_dim]
                 for b in range(bb) for h in range(num_heads)]
        return jnp.concatenate(slabs, axis=0)

    qh = split_heads(q3).astype(jnp.bfloat16)                        # [bb*nh, S, hd]
    kh = split_heads(k3).astype(jnp.bfloat16)
    vh = split_heads(v3).astype(jnp.bfloat16)

    # ---- one head-batched QK^T contraction (contracts last axes; no .T) ----
    scores = jnp.einsum('bqd,bkd->bqk', qh, kh,
                        preferred_element_type=jnp.float32)          # [bb*nh, S, S] f32

    # ---- numerically stable softmax in f32; approx reciprocal -> EUP slot ----
    m = jnp.max(scores, axis=-1, keepdims=True)
    e = jnp.exp(scores - m)
    denom = jnp.sum(e, axis=-1, keepdims=True)
    probs = e * pl.reciprocal(denom, approx=True)                    # [bb*nh, S, S] f32

    if vis:
        probs_ref[...] = probs.reshape(bb, num_heads, S, S)

    # ---- one head-batched P@V contraction ----
    ctx = jnp.einsum('bqk,bkd->bqd', probs.astype(jnp.bfloat16), vh,
                     preferred_element_type=jnp.float32)             # [bb*nh, S, hd] f32

    # Merge heads back to the fused-lane layout [bb, S, H].  The batched-head
    # layout above removed the per-head matmuls / live context parts; this
    # single lane-merge is the only remaining head relayout.
    ctx4 = ctx.reshape(bb, num_heads, S, head_dim)
    ctx_m = jnp.concatenate([ctx4[:, h] for h in range(num_heads)], axis=-1)

    # ---- output projection: single full-K (=H) MXU matmul ----
    out = jnp.dot(ctx_m.reshape(bb * S, H).astype(jnp.bfloat16), wo_ref[...],
                  preferred_element_type=jnp.float32) + bo_ref[0]
    out_ref[...] = out.reshape(bb, S, H).astype(out_ref.dtype)


def attention_forward(hidden_states, params, *, num_heads, vis=True,
                      block_b=None):
    """Runs the Attention forward pass.  Returns (attention_output, weights)."""
    B, S, H = hidden_states.shape
    assert H % num_heads == 0
    head_dim = H // num_heads

    wq, bq, wk, bk, wv, bv, wo, bo = params
    # bf16 weights for the MXU (half the DMA/VMEM); biases stay f32 and are
    # added to the f32 accumulator inside the kernel.
    wq, wk, wv, wo = (w.astype(jnp.bfloat16) for w in (wq, wk, wv, wo))
    bq, bk, bv, bo = (b.astype(jnp.float32) for b in (bq, bk, bv, bo))

    if block_b is None:
        block_b = B if B <= 8 else 1       # tiny shapes: whole batch per step
    assert B % block_b == 0

    kernel = functools.partial(_attention_kernel, num_heads=num_heads,
                               head_dim=head_dim, vis=vis)

    weight_spec = pl.BlockSpec((H, H), lambda i: (0, 0))
    bias_spec = pl.BlockSpec((1, H), lambda i: (0, 0))
    x_spec = pl.BlockSpec((block_b, S, H), lambda i: (i, 0, 0))
    out_spec = pl.BlockSpec((block_b, S, H), lambda i: (i, 0, 0))

    out_sd = jax.ShapeDtypeStruct((B, S, H), hidden_states.dtype)
    if vis:
        out_shape = (out_sd,
                     jax.ShapeDtypeStruct((B, num_heads, S, S), jnp.float32))
        out_specs = (out_spec,
                     pl.BlockSpec((block_b, num_heads, S, S),
                                  lambda i: (i, 0, 0, 0)))
    else:
        out_shape = out_sd
        out_specs = out_spec

    # Size scoped VMEM to the working set (weights are grid-invariant but still
    # double-buffered by default; activations / probs dominate at large shapes).
    bpe_w, bpe_a = 2, 4                                  # bf16 weights, f32 acts
    est = (2 * (4 * H * H * bpe_w + 4 * H * bpe_a)       # weights + biases (x2 buf)
           + 2 * 2 * block_b * S * H * bpe_a             # x / out blocks (x2 buf)
           + (2 * block_b * num_heads * S * S * bpe_a if vis else 0)
           + 8 * block_b * S * H * bpe_a                 # q/k/v/ctx temporaries
           + 4 * block_b * num_heads * S * S * bpe_a)    # scores/probs temporaries
    vmem_limit = int(min(max(2 * est, 16 * 1024 * 1024), 64 * 1024 * 1024))

    result = pl.pallas_call(
        kernel,
        out_shape=out_shape,
        grid_spec=pltpu.PrefetchScalarGridSpec(
            num_scalar_prefetch=0,
            grid=(B // block_b,),
            in_specs=[
                x_spec,
                weight_spec, bias_spec,      # query
                weight_spec, bias_spec,      # key
                weight_spec, bias_spec,      # value
                weight_spec, bias_spec,      # out proj
            ],
            out_specs=out_specs,
        ),
        compiler_params=pltpu.CompilerParams(
            dimension_semantics=("parallel",),
            vmem_limit_bytes=vmem_limit),
    )(hidden_states, wq, bq, wk, bk, wv, bv, wo, bo)

    if vis:
        out, probs = result
        return out, probs
    return result, None


def _reference_forward(x, params, *, num_heads):
    """Pure-JAX f32 reference replicating the PyTorch module (eval mode)."""
    B, S, H = x.shape
    hd = H // num_heads
    wq, bq, wk, bk, wv, bv, wo, bo = params

    def split_heads(t):  # [B,S,H] -> [B,nh,S,hd]
        return t.reshape(B, S, num_heads, hd).transpose(0, 2, 1, 3)

    q = split_heads(x @ wq + bq[0])
    k = split_heads(x @ wk + bk[0])
    v = split_heads(x @ wv + bv[0])
    scores = jnp.einsum("bhqd,bhkd->bhqk", q, k) / math.sqrt(hd)
    probs = jax.nn.softmax(scores, axis=-1)
    ctx = jnp.einsum("bhqk,bhkd->bhqd", probs, v)
    ctx = ctx.transpose(0, 2, 1, 3).reshape(B, S, H)
    out = ctx @ wo + bo[0]
    return out, probs


def init_params(key, hidden_size):
    """Deterministic parameter init (shapes as in the module's __init__)."""
    keys = jax.random.split(key, 8)
    std = 1.0 / math.sqrt(hidden_size)

    def w(k):  # stored as [in, out]  (== PyTorch weight [out, in] transposed)
        return (jax.random.normal(k, (hidden_size, hidden_size),
                                  jnp.float32) * std)

    def b(k):
        return (jax.random.normal(k, (1, hidden_size), jnp.float32) * std)

    return (w(keys[0]), b(keys[1]),   # query
            w(keys[2]), b(keys[3]),   # key
            w(keys[4]), b(keys[5]),   # value
            w(keys[6]), b(keys[7]))   # out


if __name__ == "__main__":
    # config = {'hidden_size': 32, 'num_heads': 4, 'attention_dropout_rate': 0.0}
    B, S, H, NH = 2, 8, 32, 4

    key = jax.random.PRNGKey(0)
    k_x, k_p = jax.random.split(key)
    hidden_states = jax.random.normal(k_x, (B, S, H), jnp.float32)
    params = init_params(k_p, H)

    out, weights = attention_forward(hidden_states, params, num_heads=NH,
                                     vis=True)
    out = jax.block_until_ready(out)
    weights = jax.block_until_ready(weights)

    ref_out, ref_w = _reference_forward(hidden_states, params, num_heads=NH)
    assert out.shape == (B, S, H)
    assert weights.shape == (B, NH, S, S)
    # bf16 MXU operands + approximate EUP reciprocal -> looser tolerances than
    # a pure-f32 kernel, but still tight enough to catch structural errors.
    assert jnp.allclose(out, ref_out, atol=5e-2, rtol=1e-1)
    assert jnp.allclose(weights, ref_w, atol=3e-2, rtol=1e-1)

    print("KERNEL_OK")
</pallas_src>

<mosaic_0001>
module attributes {stable_mosaic.version = 11 : i64} {
  func.func @_attention_kernel(%arg0: i32, %arg1: memref<2x8x32xf32, #tpu.memory_space<vmem>>, %arg2: memref<32x32xbf16, #tpu.memory_space<vmem>>, %arg3: memref<1x32xf32, #tpu.memory_space<vmem>>, %arg4: memref<32x32xbf16, #tpu.memory_space<vmem>>, %arg5: memref<1x32xf32, #tpu.memory_space<vmem>>, %arg6: memref<32x32xbf16, #tpu.memory_space<vmem>>, %arg7: memref<1x32xf32, #tpu.memory_space<vmem>>, %arg8: memref<32x32xbf16, #tpu.memory_space<vmem>>, %arg9: memref<1x32xf32, #tpu.memory_space<vmem>>, %arg10: memref<2x8x32xf32, #tpu.memory_space<vmem>>, %arg11: memref<2x4x8x8xf32, #tpu.memory_space<vmem>>) attributes {dimension_semantics = [#tpu.dimension_semantics<parallel>], iteration_bounds = array<i64: 1>, scalar_prefetch = 0 : i64, scratch_operands = 0 : i64, tpu.core_type = #tpu.core_type<tc>, window_params = [{transform_indices = @transform_0, window_bounds = array<i64: 2, 8, 32>}, {pipeline_mode = #tpu.pipeline_mode<synchronous>, transform_indices = @transform_1, window_bounds = array<i64: 32, 32>}, {pipeline_mode = #tpu.pipeline_mode<synchronous>, transform_indices = @transform_2, window_bounds = array<i64: 1, 32>}, {pipeline_mode = #tpu.pipeline_mode<synchronous>, transform_indices = @transform_3, window_bounds = array<i64: 32, 32>}, {pipeline_mode = #tpu.pipeline_mode<synchronous>, transform_indices = @transform_4, window_bounds = array<i64: 1, 32>}, {pipeline_mode = #tpu.pipeline_mode<synchronous>, transform_indices = @transform_5, window_bounds = array<i64: 32, 32>}, {pipeline_mode = #tpu.pipeline_mode<synchronous>, transform_indices = @transform_6, window_bounds = array<i64: 1, 32>}, {pipeline_mode = #tpu.pipeline_mode<synchronous>, transform_indices = @transform_7, window_bounds = array<i64: 32, 32>}, {pipeline_mode = #tpu.pipeline_mode<synchronous>, transform_indices = @transform_8, window_bounds = array<i64: 1, 32>}, {transform_indices = @transform_9, window_bounds = array<i64: 2, 8, 32>}, {transform_indices = @transform_10, window_bounds = array<i64: 2, 4, 8, 8>}]} {
    %c0 = arith.constant 0 : index
    %c0_0 = arith.constant 0 : index
    %c0_1 = arith.constant 0 : index
    %0 = vector.load %arg1[%c0, %c0_0, %c0_1] : memref<2x8x32xf32, #tpu.memory_space<vmem>>, vector<2x8x32xf32>
    %1 = vector.shape_cast %0 : vector<2x8x32xf32> to vector<16x32xf32>
    %2 = arith.truncf %1 : vector<16x32xf32> to vector<16x32xbf16>
    %c0_2 = arith.constant 0 : index
    %c0_3 = arith.constant 0 : index
    %3 = vector.load %arg2[%c0_2, %c0_3] : memref<32x32xbf16, #tpu.memory_space<vmem>>, vector<32x32xbf16>
    %cst = arith.constant dense<0.000000e+00> : vector<16x32xf32>
    %4 = tpu.matmul %2, %3, %cst {dimension_numbers = #tpu.dot_dimension_numbers<[1], [0], [0], [1], [0, 0, 1, 1], [], []>} : vector<16x32xbf16>, vector<32x32xbf16>, vector<16x32xf32> -> vector<16x32xf32>
    %c0_4 = arith.constant 0 : index
    %c0_5 = arith.constant 0 : index
    %5 = vector.load %arg3[%c0_4, %c0_5] : memref<1x32xf32, #tpu.memory_space<vmem>>, vector<1x32xf32>
    %6 = vector.shape_cast %5 : vector<1x32xf32> to vector<32xf32>
    %7 = vector.shape_cast %6 : vector<32xf32> to vector<1x32xf32>
    %8 = vector.broadcast %7 : vector<1x32xf32> to vector<16x32xf32>
    %9 = arith.addf %4, %8 : vector<16x32xf32>
    %c0_6 = arith.constant 0 : index
    %c0_7 = arith.constant 0 : index
    %10 = vector.load %arg4[%c0_6, %c0_7] : memref<32x32xbf16, #tpu.memory_space<vmem>>, vector<32x32xbf16>
    %cst_8 = arith.constant dense<0.000000e+00> : vector<16x32xf32>
    %11 = tpu.matmul %2, %10, %cst_8 {dimension_numbers = #tpu.dot_dimension_numbers<[1], [0], [0], [1], [0, 0, 1, 1], [], []>} : vector<16x32xbf16>, vector<32x32xbf16>, vector<16x32xf32> -> vector<16x32xf32>
    %c0_9 = arith.constant 0 : index
    %c0_10 = arith.constant 0 : index
    %12 = vector.load %arg5[%c0_9, %c0_10] : memref<1x32xf32, #tpu.memory_space<vmem>>, vector<1x32xf32>
    %13 = vector.shape_cast %12 : vector<1x32xf32> to vector<32xf32>
    %14 = vector.shape_cast %13 : vector<32xf32> to vector<1x32xf32>
    %15 = vector.broadcast %14 : vector<1x32xf32> to vector<16x32xf32>
    %16 = arith.addf %11, %15 : vector<16x32xf32>
    %c0_11 = arith.constant 0 : index
    %c0_12 = arith.constant 0 : index
    %17 = vector.load %arg6[%c0_11, %c0_12] : memref<32x32xbf16, #tpu.memory_space<vmem>>, vector<32x32xbf16>
    %cst_13 = arith.constant dense<0.000000e+00> : vector<16x32xf32>
    %18 = tpu.matmul %2, %17, %cst_13 {dimension_numbers = #tpu.dot_dimension_numbers<[1], [0], [0], [1], [0, 0, 1, 1], [], []>} : vector<16x32xbf16>, vector<32x32xbf16>, vector<16x32xf32> -> vector<16x32xf32>
    %c0_14 = arith.constant 0 : index
    %c0_15 = arith.constant 0 : index
    %19 = vector.load %arg7[%c0_14, %c0_15] : memref<1x32xf32, #tpu.memory_space<vmem>>, vector<1x32xf32>
    %20 = vector.shape_cast %19 : vector<1x32xf32> to vector<32xf32>
    %21 = vector.shape_cast %20 : vector<32xf32> to vector<1x32xf32>
    %22 = vector.broadcast %21 : vector<1x32xf32> to vector<16x32xf32>
    %23 = arith.addf %18, %22 : vector<16x32xf32>
    %cst_16 = arith.constant 0.353553385 : f32
    %24 = vector.broadcast %cst_16 : f32 to vector<16x32xf32>
    %25 = arith.mulf %9, %24 : vector<16x32xf32>
    %26 = vector.shape_cast %25 : vector<16x32xf32> to vector<2x8x32xf32>
    %27 = vector.shape_cast %16 : vector<16x32xf32> to vector<2x8x32xf32>
    %28 = vector.shape_cast %23 : vector<16x32xf32> to vector<2x8x32xf32>
    %29 = vector.extract_strided_slice %26 {offsets = [0, 0, 0], sizes = [1, 8, 8], strides = [1, 1, 1]} : vector<2x8x32xf32> to vector<1x8x8xf32>
    %30 = vector.extract_strided_slice %26 {offsets = [0, 0, 8], sizes = [1, 8, 8], strides = [1, 1, 1]} : vector<2x8x32xf32> to vector<1x8x8xf32>
    %31 = vector.extract_strided_slice %26 {offsets = [0, 0, 16], sizes = [1, 8, 8], strides = [1, 1, 1]} : vector<2x8x32xf32> to vector<1x8x8xf32>
    %32 = vector.extract_strided_slice %26 {offsets = [0, 0, 24], sizes = [1, 8, 8], strides = [1, 1, 1]} : vector<2x8x32xf32> to vector<1x8x8xf32>
    %33 = vector.extract_strided_slice %26 {offsets = [1, 0, 0], sizes = [1, 8, 8], strides = [1, 1, 1]} : vector<2x8x32xf32> to vector<1x8x8xf32>
    %34 = vector.extract_strided_slice %26 {offsets = [1, 0, 8], sizes = [1, 8, 8], strides = [1, 1, 1]} : vector<2x8x32xf32> to vector<1x8x8xf32>
    %35 = vector.extract_strided_slice %26 {offsets = [1, 0, 16], sizes = [1, 8, 8], strides = [1, 1, 1]} : vector<2x8x32xf32> to vector<1x8x8xf32>
    %36 = vector.extract_strided_slice %26 {offsets = [1, 0, 24], sizes = [1, 8, 8], strides = [1, 1, 1]} : vector<2x8x32xf32> to vector<1x8x8xf32>
    %37 = tpu.concatenate %29, %30, %31, %32, %33, %34, %35, %36 in 0 : vector<1x8x8xf32>, vector<1x8x8xf32>, vector<1x8x8xf32>, vector<1x8x8xf32>, vector<1x8x8xf32>, vector<1x8x8xf32>, vector<1x8x8xf32>, vector<1x8x8xf32> -> vector<8x8x8xf32>
    %38 = arith.truncf %37 : vector<8x8x8xf32> to vector<8x8x8xbf16>
    %39 = vector.extract_strided_slice %27 {offsets = [0, 0, 0], sizes = [1, 8, 8], strides = [1, 1, 1]} : vector<2x8x32xf32> to vector<1x8x8xf32>
    %40 = vector.extract_strided_slice %27 {offsets = [0, 0, 8], sizes = [1, 8, 8], strides = [1, 1, 1]} : vector<2x8x32xf32> to vector<1x8x8xf32>
    %41 = vector.extract_strided_slice %27 {offsets = [0, 0, 16], sizes = [1, 8, 8], strides = [1, 1, 1]} : vector<2x8x32xf32> to vector<1x8x8xf32>
    %42 = vector.extract_strided_slice %27 {offsets = [0, 0, 24], sizes = [1, 8, 8], strides = [1, 1, 1]} : vector<2x8x32xf32> to vector<1x8x8xf32>
    %43 = vector.extract_strided_slice %27 {offsets = [1, 0, 0], sizes = [1, 8, 8], strides = [1, 1, 1]} : vector<2x8x32xf32> to vector<1x8x8xf32>
    %44 = vector.extract_strided_slice %27 {offsets = [1, 0, 8], sizes = [1, 8, 8], strides = [1, 1, 1]} : vector<2x8x32xf32> to vector<1x8x8xf32>
    %45 = vector.extract_strided_slice %27 {offsets = [1, 0, 16], sizes = [1, 8, 8], strides = [1, 1, 1]} : vector<2x8x32xf32> to vector<1x8x8xf32>
    %46 = vector.extract_strided_slice %27 {offsets = [1, 0, 24], sizes = [1, 8, 8], strides = [1, 1, 1]} : vector<2x8x32xf32> to vector<1x8x8xf32>
    %47 = tpu.concatenate %39, %40, %41, %42, %43, %44, %45, %46 in 0 : vector<1x8x8xf32>, vector<1x8x8xf32>, vector<1x8x8xf32>, vector<1x8x8xf32>, vector<1x8x8xf32>, vector<1x8x8xf32>, vector<1x8x8xf32>, vector<1x8x8xf32> -> vector<8x8x8xf32>
    %48 = arith.truncf %47 : vector<8x8x8xf32> to vector<8x8x8xbf16>
    %49 = vector.extract_strided_slice %28 {offsets = [0, 0, 0], sizes = [1, 8, 8], strides = [1, 1, 1]} : vector<2x8x32xf32> to vector<1x8x8xf32>
    %50 = vector.extract_strided_slice %28 {offsets = [0, 0, 8], sizes = [1, 8, 8], strides = [1, 1, 1]} : vector<2x8x32xf32> to vector<1x8x8xf32>
    %51 = vector.extract_strided_slice %28 {offsets = [0, 0, 16], sizes = [1, 8, 8], strides = [1, 1, 1]} : vector<2x8x32xf32> to vector<1x8x8xf32>
    %52 = vector.extract_strided_slice %28 {offsets = [0, 0, 24], sizes = [1, 8, 8], strides = [1, 1, 1]} : vector<2x8x32xf32> to vector<1x8x8xf32>
    %53 = vector.extract_strided_slice %28 {offsets = [1, 0, 0], sizes = [1, 8, 8], strides = [1, 1, 1]} : vector<2x8x32xf32> to vector<1x8x8xf32>
    %54 = vector.extract_strided_slice %28 {offsets = [1, 0, 8], sizes = [1, 8, 8], strides = [1, 1, 1]} : vector<2x8x32xf32> to vector<1x8x8xf32>
    %55 = vector.extract_strided_slice %28 {offsets = [1, 0, 16], sizes = [1, 8, 8], strides = [1, 1, 1]} : vector<2x8x32xf32> to vector<1x8x8xf32>
    %56 = vector.extract_strided_slice %28 {offsets = [1, 0, 24], sizes = [1, 8, 8], strides = [1, 1, 1]} : vector<2x8x32xf32> to vector<1x8x8xf32>
    %57 = tpu.concatenate %49, %50, %51, %52, %53, %54, %55, %56 in 0 : vector<1x8x8xf32>, vector<1x8x8xf32>, vector<1x8x8xf32>, vector<1x8x8xf32>, vector<1x8x8xf32>, vector<1x8x8xf32>, vector<1x8x8xf32>, vector<1x8x8xf32> -> vector<8x8x8xf32>
    %58 = arith.truncf %57 : vector<8x8x8xf32> to vector<8x8x8xbf16>
    "tpu.trace_start"() <{level = 10 : i32, message = "bqd,bkd->bqk"}> : () -> ()
    %cst_17 = arith.constant dense<0.000000e+00> : vector<8x8x8xf32>
    %59 = tpu.matmul %38, %48, %cst_17 {dimension_numbers = #tpu.dot_dimension_numbers<[2], [2], [1], [1], [0, 0, 0, 1, 1, 1], [0], [0]>} : vector<8x8x8xbf16>, vector<8x8x8xbf16>, vector<8x8x8xf32> -> vector<8x8x8xf32>
    "tpu.trace_stop"() : () -> ()
    %cst_18 = arith.constant dense<0xFF800000> : vector<8x8xf32>
    %60 = vector.multi_reduction <maximumf>, %59, %cst_18 [2] : vector<8x8x8xf32> to vector<8x8xf32>
    %61 = vector.shape_cast %60 : vector<8x8xf32> to vector<8x8x1xf32>
    %62 = vector.broadcast %61 : vector<8x8x1xf32> to vector<8x8x8xf32>
    %63 = arith.subf %59, %62 : vector<8x8x8xf32>
    %64 = math.exp %63 : vector<8x8x8xf32>
    %cst_19 = arith.constant dense<0.000000e+00> : vector<8x8xf32>
    %65 = vector.multi_reduction <add>, %64, %cst_19 [2] : vector<8x8x8xf32> to vector<8x8xf32>
    %66 = vector.shape_cast %65 : vector<8x8xf32> to vector<8x8x1xf32>
    %67 = tpu.reciprocal %66 {approx = true} : vector<8x8x1xf32> -> vector<8x8x1xf32>
    %68 = vector.broadcast %67 : vector<8x8x1xf32> to vector<8x8x8xf32>
    %69 = arith.mulf %64, %68 : vector<8x8x8xf32>
    %70 = vector.shape_cast %69 : vector<8x8x8xf32> to vector<2x4x8x8xf32>
    %c0_20 = arith.constant 0 : index
    %c0_21 = arith.constant 0 : index
    %c0_22 = arith.constant 0 : index
    %c0_23 = arith.constant 0 : index
    %71 = vector.load %arg11[%c0_20, %c0_21, %c0_22, %c0_23] : memref<2x4x8x8xf32, #tpu.memory_space<vmem>>, vector<2x4x8x8xf32>
    tpu.vector_store %arg11[%c0_20, %c0_21, %c0_22, %c0_23], %70 {strides = array<i32>} : memref<2x4x8x8xf32, #tpu.memory_space<vmem>>, vector<2x4x8x8xf32>,
    %72 = arith.truncf %69 : vector<8x8x8xf32> to vector<8x8x8xbf16>
    "tpu.trace_start"() <{level = 10 : i32, message = "bqk,bkd->bqd"}> : () -> ()
    %cst_24 = arith.constant dense<0.000000e+00> : vector<8x8x8xf32>
    %73 = tpu.matmul %72, %58, %cst_24 {dimension_numbers = #tpu.dot_dimension_numbers<[2], [1], [1], [2], [0, 0, 0, 1, 1, 2], [0], [0]>} : vector<8x8x8xbf16>, vector<8x8x8xbf16>, vector<8x8x8xf32> -> vector<8x8x8xf32>
    "tpu.trace_stop"() : () -> ()
    %74 = vector.shape_cast %73 : vector<8x8x8xf32> to vector<2x4x8x8xf32>
    %75 = vector.extract_strided_slice %74 {offsets = [0, 0, 0, 0], sizes = [2, 1, 8, 8], strides = [1, 1, 1, 1]} : vector<2x4x8x8xf32> to vector<2x1x8x8xf32>
    %76 = vector.shape_cast %75 : vector<2x1x8x8xf32> to vector<2x8x8xf32>
    %77 = vector.extract_strided_slice %74 {offsets = [0, 1, 0, 0], sizes = [2, 1, 8, 8], strides = [1, 1, 1, 1]} : vector<2x4x8x8xf32> to vector<2x1x8x8xf32>
    %78 = vector.shape_cast %77 : vector<2x1x8x8xf32> to vector<2x8x8xf32>
    %79 = vector.extract_strided_slice %74 {offsets = [0, 2, 0, 0], sizes = [2, 1, 8, 8], strides = [1, 1, 1, 1]} : vector<2x4x8x8xf32> to vector<2x1x8x8xf32>
    %80 = vector.shape_cast %79 : vector<2x1x8x8xf32> to vector<2x8x8xf32>
    %81 = vector.extract_strided_slice %74 {offsets = [0, 3, 0, 0], sizes = [2, 1, 8, 8], strides = [1, 1, 1, 1]} : vector<2x4x8x8xf32> to vector<2x1x8x8xf32>
    %82 = vector.shape_cast %81 : vector<2x1x8x8xf32> to vector<2x8x8xf32>
    %83 = tpu.concatenate %76, %78, %80, %82 in 2 : vector<2x8x8xf32>, vector<2x8x8xf32>, vector<2x8x8xf32>, vector<2x8x8xf32> -> vector<2x8x32xf32>
    %84 = vector.shape_cast %83 : vector<2x8x32xf32> to vector<16x32xf32>
    %85 = arith.truncf %84 : vector<16x32xf32> to vector<16x32xbf16>
    %c0_25 = arith.constant 0 : index
    %c0_26 = arith.constant 0 : index
    %86 = vector.load %arg8[%c0_25, %c0_26] : memref<32x32xbf16, #tpu.memory_space<vmem>>, vector<32x32xbf16>
    %cst_27 = arith.constant dense<0.000000e+00> : vector<16x32xf32>
    %87 = tpu.matmul %85, %86, %cst_27 {dimension_numbers = #tpu.dot_dimension_numbers<[1], [0], [0], [1], [0, 0, 1, 1], [], []>} : vector<16x32xbf16>, vector<32x32xbf16>, vector<16x32xf32> -> vector<16x32xf32>
    %c0_28 = arith.constant 0 : index
    %c0_29 = arith.constant 0 : index
    %88 = vector.load %arg9[%c0_28, %c0_29] : memref<1x32xf32, #tpu.memory_space<vmem>>, vector<1x32xf32>
    %89 = vector.shape_cast %88 : vector<1x32xf32> to vector<32xf32>
    %90 = vector.shape_cast %89 : vector<32xf32> to vector<1x32xf32>
    %91 = vector.broadcast %90 : vector<1x32xf32> to vector<16x32xf32>
    %92 = arith.addf %87, %91 : vector<16x32xf32>
    %93 = vector.shape_cast %92 : vector<16x32xf32> to vector<2x8x32xf32>
    %c0_30 = arith.constant 0 : index
    %c0_31 = arith.constant 0 : index
    %c0_32 = arith.constant 0 : index
    %94 = vector.load %arg10[%c0_30, %c0_31, %c0_32] : memref<2x8x32xf32, #tpu.memory_space<vmem>>, vector<2x8x32xf32>
    tpu.vector_store %arg10[%c0_30, %c0_31, %c0_32], %93 {strides = array<i32>} : memref<2x8x32xf32, #tpu.memory_space<vmem>>, vector<2x8x32xf32>,
    return
  }
  func.func @transform_0(%arg0: i32) -> (i32, i32, i32) {
    %c0_i32 = arith.constant 0 : i32
    %c0_i32_0 = arith.constant 0 : i32
    %c0_i32_1 = arith.constant 0 : i32
    return %arg0, %c0_i32, %c0_i32_0 : i32, i32, i32
  }
  func.func @transform_1(%arg0: i32) -> (i32, i32) {
    %c0_i32 = arith.constant 0 : i32
    %c0_i32_0 = arith.constant 0 : i32
    %c0_i32_1 = arith.constant 0 : i32
    return %c0_i32, %c0_i32_0 : i32, i32
  }
  func.func @transform_2(%arg0: i32) -> (i32, i32) {
    %c0_i32 = arith.constant 0 : i32
    %c0_i32_0 = arith.constant 0 : i32
    %c0_i32_1 = arith.constant 0 : i32
    return %c0_i32, %c0_i32_0 : i32, i32
  }
  func.func @transform_3(%arg0: i32) -> (i32, i32) {
    %c0_i32 = arith.constant 0 : i32
    %c0_i32_0 = arith.constant 0 : i32
    %c0_i32_1 = arith.constant 0 : i32
    return %c0_i32, %c0_i32_0 : i32, i32
  }
  func.func @transform_4(%arg0: i32) -> (i32, i32) {
    %c0_i32 = arith.constant 0 : i32
    %c0_i32_0 = arith.constant 0 : i32
    %c0_i32_1 = arith.constant 0 : i32
    return %c0_i32, %c0_i32_0 : i32, i32
  }
  func.func @transform_5(%arg0: i32) -> (i32, i32) {
    %c0_i32 = arith.constant 0 : i32
    %c0_i32_0 = arith.constant 0 : i32
    %c0_i32_1 = arith.constant 0 : i32
    return %c0_i32, %c0_i32_0 : i32, i32
  }
  func.func @transform_6(%arg0: i32) -> (i32, i32) {
    %c0_i32 = arith.constant 0 : i32
    %c0_i32_0 = arith.constant 0 : i32
    %c0_i32_1 = arith.constant 0 : i32
    return %c0_i32, %c0_i32_0 : i32, i32
  }
  func.func @transform_7(%arg0: i32) -> (i32, i32) {
    %c0_i32 = arith.constant 0 : i32
    %c0_i32_0 = arith.constant 0 : i32
    %c0_i32_1 = arith.constant 0 : i32
    return %c0_i32, %c0_i32_0 : i32, i32
  }
  func.func @transform_8(%arg0: i32) -> (i32, i32) {
    %c0_i32 = arith.constant 0 : i32
    %c0_i32_0 = arith.constant 0 : i32
    %c0_i32_1 = arith.constant 0 : i32
    return %c0_i32, %c0_i32_0 : i32, i32
  }
  func.func @transform_9(%arg0: i32) -> (i32, i32, i32) {
    %c0_i32 = arith.constant 0 : i32
    %c0_i32_0 = arith.constant 0 : i32
    %c0_i32_1 = arith.constant 0 : i32
    return %arg0, %c0_i32, %c0_i32_0 : i32, i32, i32
  }
  func.func @transform_10(%arg0: i32) -> (i32, i32, i32, i32) {
    %c0_i32 = arith.constant 0 : i32
    %c0_i32_0 = arith.constant 0 : i32
    %c0_i32_1 = arith.constant 0 : i32
    %c0_i32_2 = arith.constant 0 : i32
    return %arg0, %c0_i32, %c0_i32_0, %c0_i32_1 : i32, i32, i32, i32
  }
}

</mosaic_0001>

<bundles_post_ra>
// kernel: tpu_custom_call.1
= control target key start
LH: loop header
LB: loop body
LE: loop exit
PB: predicated region body
PF: predicated region fallthrough
CT: control target
= control target key end

     0   :  { %16 = vsyncpa [#allocation3], 0  ;;  %s2142_s0 = inlined_call_operand.hbm [shape: f32[2,8,32], index: 0, kind: input, shape index: {}]   ;;  %s2143_s1 = inlined_call_operand.hbm [shape: bf16[32,32], index: 1, kind: input, shape index: {}]   ;;  %s2144_s2 = inlined_call_operand.vmem [shape: f32[1,32], index: 2, kind: input, shape index: {}]   ;;  %s2145_s3 = inlined_call_operand.hbm [shape: bf16[32,32], index: 3, kind: input, shape index: {}]   ;;  %s2146_s4 = inlined_call_operand.vmem [shape: f32[1,32], index: 4, kind: input, shape index: {}]   ;;  %s2147_s5 = inlined_call_operand.vmem [shape: bf16[32,32], index: 5, kind: input, shape index: {}]   ;;  %s2148_s6 = inlined_call_operand.vmem [shape: f32[1,32], index: 6, kind: input, shape index: {}]   ;;  %s2149_s7 = inlined_call_operand.hbm [shape: bf16[32,32], index: 7, kind: input, shape index: {}]   ;;  %s2150_s8 = inlined_call_operand.vmem [shape: f32[1,32], index: 8, kind: input, shape index: {}]   ;;  %s2151_s9 = inlined_call_operand.hbm [shape: f32[2,8,32], index: 9, kind: output, shape index: {0}]   ;;  %s2152_s10 = inlined_call_operand.hbm [shape: f32[2,4,8,8], index: 10, kind: output, shape index: {1}]  }
   0x1   :  { %17 = vsyncpa [#allocation6], 0 }
   0x2   :  { %18 = vsyncpa [#allocation9], 0 }
   0x3   :  { %19 = vsyncpa [#allocation4], 0 }
   0x4   :  { %20 = vsyncpa [#allocation12], 0  ;;  %s1774_s13 = smov [#allocation5]   ;;  %s1632_s17 = scalar_lea.hbm %s2143_s1, 256 }
   0x5   :  { %s38_s14 = sshll.u32 %s1774_s13, 4  ;;  %p1633_p0 = scmp.ne.s32.totalorder %s2143_s1, %s1632_s17  ;;  %s39_s14 = int_to_ptr.vmem [resolvable:$true] %s38_s14 }
   0x6   :  { %p1636_p1 = scmp.lt.u32.totalorder %s1632_s17, %s2143_s1 }
   0x8   :  { %p1638_p2 = pnand %p1636_p1, %p1633_p0 }
   0xa   :  { %1641 = shalt.err (!%p1638_p2)
}
   0xb   :  { %s1642_s22 = scalar_lea.vmem %s39_s14, 256  ;;  %p1647_p4 = scmp.lt.s32.totalorder %s39_s14, %s39_s14 }
   0xc   :  { %p1643_p3 = scmp.ne.s32.totalorder %s39_s14, %s1642_s22  ;;  %p1648_p5 = scmp.lt.s32.totalorder %s1642_s22, %s1642_s22 }
   0xe   :  { %p1649_p6 = por %p1648_p5, %p1647_p4 }
  0x10   :  { %p1650_p7 = pnand %p1649_p6, %p1643_p3 }
  0x12   :  { %1653 = shalt.err (!%p1650_p7)
}
  0x13   :  { %s1775_s23 = smov 64   ;;  %s1776_s24 = smov 4  }
  0x14   :  { %44 = dma.hbm_to_vmem [thread:$0]  %s2143_s1, 256, %s39_s14, [#allocation6], %s1775_s23, %s1775_s23, %s1776_s24  }
  0x15   :  { %s1777_s27 = smov [#allocation2]   ;;  %s1654_s11 = scalar_lea.hbm %s2142_s0, 256 }
  0x16   :  { %s26_s28 = sshll.u32 %s1777_s27, 4  ;;  %p1655_p8 = scmp.ne.s32.totalorder %s2142_s0, %s1654_s11  ;;  %s27_s28 = int_to_ptr.vmem [resolvable:$true] %s26_s28 }
  0x17   :  { %p1658_p9 = scmp.lt.u32.totalorder %s1654_s11, %s2142_s0 }
  0x19   :  { %p1660_p10 = pnand %p1658_p9, %p1655_p8 }
  0x1b   :  { %1663 = shalt.err (!%p1660_p10)
}
  0x1c   :  { %s1664_s17 = scalar_lea.vmem %s27_s28, 256  ;;  %p1669_p12 = scmp.lt.s32.totalorder %s27_s28, %s27_s28 }
  0x1d   :  { %p1665_p11 = scmp.ne.s32.totalorder %s27_s28, %s1664_s17  ;;  %p1670_p13 = scmp.lt.s32.totalorder %s1664_s17, %s1664_s17 }
  0x1f   :  { %p1671_p0 = por %p1670_p13, %p1669_p12 }
  0x21   :  { %p1672_p1 = pnand %p1671_p0, %p1665_p11 }
  0x23   :  { %1675 = shalt.err (!%p1672_p1)
}
  0x24   :  { %s1778_s1 = smov 128   ;;  %s1779_s14 = smov 8  }
  0x25   :  { %32 = dma.hbm_to_vmem [thread:$0]  %s2142_s0, 256, %s27_s28, [#allocation3], %s1778_s1, %s1778_s1, %s1779_s14  }
  0x26   :  { %s1780_s20 = smov [#allocation7]   ;;  %s1781_s22 = smov [#allocation8]  }
  0x27   :  { %s52_s21 = sshll.u32 %s1780_s20, 4  ;;  %s70_s25 = sshll.u32 %s1781_s22, 4  ;;  %s53_s21 = int_to_ptr.vmem [resolvable:$true] %s52_s21  ;;  %s1876_s25 = int_to_ptr.vmem [resolvable:$true] %s70_s25 }
  0x28   :  { %s1676_s29 = scalar_lea.hbm %s2145_s3, 256 }
  0x29   :  { %p1677_p2 = scmp.ne.s32.totalorder %s2145_s3, %s1676_s29  ;;  %p1680_p3 = scmp.lt.u32.totalorder %s1676_s29, %s2145_s3 }
  0x2b   :  { %p1682_p4 = pnand %p1680_p3, %p1677_p2 }
  0x2d   :  { %1685 = shalt.err (!%p1682_p4)
}
  0x2e   :  { %s1686_s0 = scalar_lea.vmem %s53_s21, 256  ;;  %p1691_p6 = scmp.lt.s32.totalorder %s53_s21, %s53_s21 }
  0x2f   :  { %p1687_p5 = scmp.ne.s32.totalorder %s53_s21, %s1686_s0  ;;  %p1692_p7 = scmp.lt.s32.totalorder %s1686_s0, %s1686_s0 }
  0x31   :  { %p1693_p8 = por %p1692_p7, %p1691_p6 }
  0x33   :  { %p1694_p9 = pnand %p1693_p8, %p1687_p5 }
  0x35   :  { %1697 = shalt.err (!%p1694_p9)
}
  0x36   :  { %58 = dma.hbm_to_vmem [thread:$0]  %s2145_s3, 256, %s53_s21, [#allocation6], %s1775_s23, %s1775_s23, %s1776_s24  }
  0x37   :  { %s1698_s18 = scalar_lea.hbm %s2149_s7, 256 }
  0x38   :  { %p1699_p10 = scmp.ne.s32.totalorder %s2149_s7, %s1698_s18  ;;  %p1702_p11 = scmp.lt.u32.totalorder %s1698_s18, %s2149_s7 }
  0x3a   :  { %p1704_p12 = pnand %p1702_p11, %p1699_p10 }
  0x3c   :  { %1707 = shalt.err (!%p1704_p12)
}
  0x3d   :  { %s1708_s27 = scalar_lea.vmem %s1876_s25, 256  ;;  %p1713_p0 = scmp.lt.s32.totalorder %s1876_s25, %s1876_s25 }
  0x3e   :  { %p1709_p13 = scmp.ne.s32.totalorder %s1876_s25, %s1708_s27  ;;  %p1714_p1 = scmp.lt.s32.totalorder %s1708_s27, %s1708_s27 }
  0x40   :  { %p1715_p2 = por %p1714_p1, %p1713_p0 }
  0x42   :  { %p1716_p3 = pnand %p1715_p2, %p1709_p13 }
  0x44   :  { %1719 = shalt.err (!%p1716_p3)
}
  0x45   :  { %76 = dma.hbm_to_vmem [thread:$0]  %s2149_s7, 256, %s1876_s25, [#allocation9], %s1775_s23, %s1775_s23, %s1776_s24  }
  0x46   :  { %1764 = dma.done.wait [#allocation3], 256  }
  0x47   :  { %1765 = vsyncadd [#allocation3], 4294967040 }
  0x48   :  { %1766 = dma.done.wait [#allocation6], 512  }
  0x49   :  { %1767 = vsyncadd [#allocation6], 4294966784 }
  0x4a   :  { %1768 = dma.done.wait [#allocation9], 256  }
  0x4b   :  { %1769 = vsyncadd [#allocation9], 4294967040  ;;  %v1782_v0 = vmov 0.0   ;;  %vm1783_vm0 = vmmov 0   ;;  %v1592_v1 = vld [vmem:[#allocation5] sm:$0xff]   ;;  %v1593_v2 = vld [vmem:[#allocation7] sm:$0xff]  }
  0x4c   :  { %1432 = vmatprep.subr.bf16.mxu0 %v1782_v0  ;;  %1440 = vmatprep.subr.bf16.mxu1 %v1782_v0  ;;  %v1594_v3 = vld [vmem:[#allocation5 + $0x8] sm:$0xff]   ;;  %v1595_v4 = vld [vmem:[#allocation7 + $0x8] sm:$0xff]   ;;  %v92_v5 = vld [vmem:[#allocation2] sm:$0xff]  ;;  %vm118_vm1 = vcmask 261120   ;;  %vm377_vm2 = vcmask 64512   ;;  %vm853_vm3 = vcmask 1043456  }
  0x4d   :  { %1436 = vmatprep.mubr.msk.bf16.mxu0 %vm1783_vm0, %v1782_v0  ;;  %1444 = vmatprep.mubr.msk.bf16.mxu1 %vm1783_vm0, %v1782_v0  ;;  %v93_v6 = vld [vmem:[#allocation2 + $0x8] sm:$0xff]  ;;  %v1596_v8 = vld [vmem:[%s2147_s5] sm:$0xff]   ;;  %s1788_s28 = smov 16   ;;  %vm1245_vm4 = vcmask 130048   ;;  %vm1248_vm5 = vcmask 195584   ;;  %s1789_s15 = smov [#allocation11]  }
  0x4e   :  { %1433 = vmatpush3.bf16.msra.mxu0 %v1592_v1  ;;  %1441 = vmatpush3.bf16.msra.mxu1 %v1593_v2  ;;  %v94_v7 = vpack.c.bf16 %v93_v6, %v92_v5  ;;  %v1597_v9 = vld [vmem:[%s2147_s5 + $0x8] sm:$0xff]   ;;  %v1356_v10 = vld [vmem:[%s2144_s2] ss:$0 sm:$0xff]  ;;  %s1784_s5 = smov 120   ;;  %s1785_s2 = smov 112  }
  0x4f   :  { %1434 = vmatprep.subr.bf16.mxu0 %v1782_v0  ;;  %1442 = vmatprep.subr.bf16.mxu1 %v1782_v0  ;;  %v1360_v11 = vld [vmem:[%s2146_s4] ss:$0 sm:$0xff]  ;;  %s1786_s4 = smov 104   ;;  %s1338_s16 = sshll.u32 %s1789_s15, 4  ;;  %s1339_s16 = int_to_ptr.vmem [resolvable:$true] %s1338_s16 }
  0x50   :  { %v1364_v29 = vld [vmem:[%s2148_s6] ss:$0 sm:$0xff]  ;;  %s1787_s6 = smov 24   ;;  %s1720_s17 = scalar_lea.vmem %s1339_s16, 1024 }
  0x51   :  { %p1721_p4 = scmp.ne.s32.totalorder %s1339_s16, %s1720_s17  ;;  %p1725_p5 = scmp.lt.s32.totalorder %s1339_s16, %s1339_s16 }
  0x52   :  { %1435 = vmatpush3.bf16.msra.mxu0 %v1594_v3  ;;  %1443 = vmatpush3.bf16.msra.mxu1 %v1595_v4  ;;  %p1726_p6 = scmp.lt.s32.totalorder %s1720_s17, %s1720_s17 }
  0x53   :  { %1448 = vmatprep.subr.bf16.mxu0 %v1782_v0  ;;  %1456 = vmatprep.subr.bf16.mxu1 %v1782_v0 }
  0x54   :  { %p1727_p7 = por %p1726_p6, %p1725_p5 }
  0x55   :  { %1437 = vmatmul.mubr.msk.bf16.vlgmr.msra.gmra.mrb[0].mxu0 %vm118_vm1, %v94_v7  ;;  %1445 = vmatmul.mubr.msk.bf16.vlgmr.msra.gmra.mrb[0].mxu1 %vm118_vm1, %v94_v7 }
  0x56   :  { %1452 = vmatprep.mubr.msk.bf16.mxu0 %vm1783_vm0, %v1782_v0  ;;  %1458 = vmatprep.mubr.msk.bf16.mxu1 %vm1783_vm0, %v1782_v0  ;;  %p1728_p8 = pnand %p1727_p7, %p1721_p4 }
  0x57   :  { %1449 = vmatpush3.bf16.msra.mxu0 %v1596_v8 }
  0x58   :  { %1450 = vmatprep.subr.bf16.mxu0 %v1782_v0 }
  0x5b   :  { %1451 = vmatpush3.bf16.msra.mxu0 %v1597_v9 }
  0x5c   :  { %1462 = vmatprep.subr.bf16.mxu0 %v1782_v0 }
  0x5e   :  { %1453 = vmatmul.mubr.msk.bf16.vlgmr.msra.gmra.mrb[4].mxu0 %vm118_vm1, %v94_v7 }
  0x5f   :  { %1464 = vmatprep.mubr.msk.bf16.mxu0 %vm1783_vm0, %v1782_v0 }
 0x128   :  { %v156_v12 = vpop.f32.mrb[0].mxu0  ;;  %v220_v14 = vpop.f32.mrb[0].mxu1 }
 0x129   :  { %v157_v13 = vadd.f32 %v1356_v10, %v156_v12  ;;  %v1438_v15 = vpop.f32.mrb[1].mxu0  ;;  %v221_v16 = vadd.f32 %v1360_v11, %v220_v14  ;;  %v1446_v17 = vpop.f32.mrb[1].mxu1 }
 0x12a   :  { %v159_v18 = vpop.f32.mrb[2].mxu0  ;;  %v223_v20 = vpop.f32.mrb[2].mxu1 }
 0x12b   :  { %v291_v19 = vmul.f32 0.35355338, %v157_v13  ;;  %v1439_v21 = vpop.f32.mrb[3].mxu0  ;;  %322 = vrot.lane.b32.xlu0 %v221_v16, %s1784_s5  ;;  %v1447_v22 = vpop.f32.mrb[3].mxu1  ;;  %v341_v23 = vpack.c.bf16 %v221_v16, %v221_v16  ;;  %v160_v26 = vadd.f32 %v1356_v10, %v159_v18  ;;  %v224_v27 = vadd.f32 %v1360_v11, %v223_v20 }
 0x12d   :  { %294 = vrot.lane.b32.xlu1 %v291_v19, %s1784_s5  ;;  %v382_v24 = vsel %vm377_vm2, %v341_v23, 0  ;;  %v313_v25 = vpack.c.bf16 %v291_v19, %v291_v19  ;;  %v292_v28 = vmul.f32 0.35355338, %v160_v26  ;;  %v345_v48 = vpack.c.bf16 %v224_v27, %v224_v27 }
 0x12e   :  { %1457 = vmatpush3.bf16.xpose.msra.mxu1 %v382_v24 }
 0x12f   :  { %325 = vrot.lane.b32.xlu0 %v221_v16, %s1785_s2  ;;  %1468 = vmatprep.subr.bf16.mxu1 %v1782_v0  ;;  %v566_v53 = vsel %vm377_vm2, %v345_v48, 0  ;;  %v317_v59 = vpack.c.bf16 %v292_v28, %v292_v28 }
 0x131   :  { %328 = vrot.lane.b32.xlu1 %v221_v16, %s1786_s4  ;;  %v284_v30 = vpop.f32.mrb[4].mxu0 }
 0x132   :  { %v1454_v32 = vpop.f32.mrb[5].mxu0  ;;  %v1987_v60 = vadd.f32 %v1364_v29, %v284_v30 }
 0x133   :  { %297 = vrot.lane.b32.xlu0 %v291_v19, %s1785_s2  ;;  %v287_v35 = vpop.f32.mrb[6].mxu0 }
 0x134   :  { %v1966_v36 = vadd.f32 %v1364_v29, %v287_v35  ;;  %v1455_v37 = vpop.f32.mrb[7].mxu0  ;;  %v369_v1 = vpack.c.bf16 %v1987_v60, %v1987_v60 }
 0x135   :  { %300 = vrot.lane.b32.xlu1 %v291_v19, %s1786_s4  ;;  %1459 = vmatmul.mubr.msk.bf16.vlgmr.msra.gmra.mrb[4].mxu1 %vm377_vm2, %v313_v25 }
 0x136   :  { %1470 = vmatprep.mubr.msk.bf16.mxu1 %vm1783_vm0, %v1782_v0  ;;  %v855_v5 = vsel %vm853_vm3, %v369_v1, 0 }
 0x137   :  { %332 = vrot.lane.b32.xlu0 %v224_v27, %s1784_s5 }
 0x139   :  { %335 = vrot.lane.b32.xlu1 %v224_v27, %s1785_s2 }
 0x13b   :  { %304 = vrot.lane.b32.xlu0 %v292_v28, %s1784_s5 }
 0x13d   :  { %338 = vrot.lane.b32.xlu1 %v224_v27, %s1786_s4 }
 0x13f   :  { %307 = vrot.lane.b32.xlu0 %v292_v28, %s1785_s2 }
 0x141   :  { %310 = vrot.lane.b32.xlu1 %v292_v28, %s1786_s4 }
 0x19d   :  { %v323_v31 = vpop.permute.xlu0 %322 }
 0x19e   :  { %v342_v33 = vpack.c.bf16 %v323_v31, %v323_v31 }
 0x19f   :  { %v295_v34 = vpop.permute.xlu1 %294 }
 0x1a0   :  { %v428_v38 = vsel %vm377_vm2, %v342_v33, 0  ;;  %v314_v45 = vpack.c.bf16 %v295_v34, %v295_v34 }
 0x1a1   :  { %v326_v39 = vpop.permute.xlu0 %325  ;;  %1463 = vmatpush3.bf16.xpose.msra.mxu0 %v428_v38 }
 0x1a2   :  { %v343_v40 = vpack.c.bf16 %v326_v39, %v326_v39  ;;  %1474 = vmatprep.subr.bf16.mxu0 %v1782_v0 }
 0x1a3   :  { %v329_v41 = vpop.permute.xlu1 %328 }
 0x1a4   :  { %v474_v42 = vsel %vm377_vm2, %v343_v40, 0  ;;  %v344_v43 = vpack.c.bf16 %v329_v41, %v329_v41 }
 0x1a5   :  { %v298_v44 = vpop.permute.xlu0 %297  ;;  %1469 = vmatpush3.bf16.xpose.msra.mxu1 %v474_v42 }
 0x1a6   :  { %1480 = vmatprep.subr.bf16.mxu1 %v1782_v0  ;;  %v520_v47 = vsel %vm377_vm2, %v344_v43, 0  ;;  %v315_v50 = vpack.c.bf16 %v298_v44, %v298_v44 }
 0x1a7   :  { %v301_v46 = vpop.permute.xlu1 %300 }
 0x1a8   :  { %1465 = vmatmul.mubr.msk.bf16.vlgmr.msra.gmra.mrb[8].mxu0 %vm377_vm2, %v314_v45  ;;  %v316_v54 = vpack.c.bf16 %v301_v46, %v301_v46 }
 0x1a9   :  { %v333_v49 = vpop.permute.xlu0 %332  ;;  %1475 = vmatpush3.bf16.xpose.msra.mxu0 %v520_v47  ;;  %1476 = vmatprep.mubr.msk.bf16.mxu0 %vm1783_vm0, %v1782_v0 }
 0x1aa   :  { %1486 = vmatprep.subr.bf16.mxu0 %v1782_v0  ;;  %v346_v52 = vpack.c.bf16 %v333_v49, %v333_v49 }
 0x1ab   :  { %v336_v51 = vpop.permute.xlu1 %335 }
 0x1ac   :  { %1471 = vmatmul.mubr.msk.bf16.vlgmr.msra.gmra.mrb[8].mxu1 %vm377_vm2, %v315_v50  ;;  %v612_v55 = vsel %vm377_vm2, %v346_v52, 0  ;;  %v347_v56 = vpack.c.bf16 %v336_v51, %v336_v51 }
 0x1ad   :  { %1481 = vmatpush3.bf16.xpose.msra.mxu1 %v566_v53  ;;  %1482 = vmatprep.mubr.msk.bf16.mxu1 %vm1783_vm0, %v1782_v0  ;;  %v305_v57 = vpop.permute.xlu0 %304 }
 0x1ae   :  { %1492 = vmatprep.subr.bf16.mxu1 %v1782_v0  ;;  %v658_v61 = vsel %vm377_vm2, %v347_v56, 0  ;;  %v318_v63 = vpack.c.bf16 %v305_v57, %v305_v57 }
 0x1af   :  { %v339_v58 = vpop.permute.xlu1 %338 }
 0x1b0   :  { %1477 = vmatmul.mubr.msk.bf16.vlgmr.msra.gmra.mrb[12].mxu0 %vm377_vm2, %v316_v54  ;;  %v348_v62 = vpack.c.bf16 %v339_v58, %v339_v58 }
 0x1b1   :  { %1487 = vmatpush3.bf16.xpose.msra.mxu0 %v612_v55  ;;  %1488 = vmatprep.mubr.msk.bf16.mxu0 %vm1783_vm0, %v1782_v0  ;;  %v308_v2 = vpop.permute.xlu0 %307 }
 0x1b2   :  { %1498 = vmatprep.subr.bf16.mxu0 %v1782_v0  ;;  %v704_v3 = vsel %vm377_vm2, %v348_v62, 0  ;;  %v319_v4 = vpack.c.bf16 %v308_v2, %v308_v2 }
 0x1b3   :  { %v311_v6 = vpop.permute.xlu1 %310 }
 0x1b4   :  { %1483 = vmatmul.mubr.msk.bf16.vlgmr.msra.gmra.mrb[12].mxu1 %vm377_vm2, %v317_v59  ;;  %v320_v7 = vpack.c.bf16 %v311_v6, %v311_v6 }
 0x1b5   :  { %1493 = vmatpush3.bf16.xpose.msra.mxu1 %v658_v61  ;;  %1494 = vmatprep.mubr.msk.bf16.mxu1 %vm1783_vm0, %v1782_v0 }
 0x1b6   :  { %1504 = vmatprep.subr.bf16.mxu1 %v1782_v0 }
 0x1b8   :  { %1489 = vmatmul.mubr.msk.bf16.vlgmr.msra.gmra.mrb[16].mxu0 %vm377_vm2, %v318_v63 }
 0x1b9   :  { %1499 = vmatpush3.bf16.xpose.msra.mxu0 %v704_v3  ;;  %1500 = vmatprep.mubr.msk.bf16.mxu0 %vm1783_vm0, %v1782_v0 }
 0x1ba   :  { %1510 = vmatprep.subr.bf16.mxu0 %v1782_v0 }
 0x1bc   :  { %1495 = vmatmul.mubr.msk.bf16.vlgmr.msra.gmra.mrb[16].mxu1 %vm377_vm2, %v319_v4 }
 0x1bd   :  { %1505 = vmatpush3.bf16.msra.mxu1 %v855_v5  ;;  %1506 = vmatprep.mubr.msk.bf16.mxu1 %vm1783_vm0, %v1782_v0 }
 0x1be   :  { %1516 = vmatprep.subr.bf16.mxu1 %v1782_v0 }
 0x1c0   :  { %1501 = vmatmul.mubr.msk.bf16.vlgmr.msra.gmra.mrb[20].mxu0 %vm377_vm2, %v320_v7 }
 0x1c1   :  { %1512 = vmatprep.mubr.msk.bf16.mxu0 %vm1783_vm0, %v1782_v0 }
 0x208   :  { %v418_v8 = vpop.f32.mrb[4].mxu1 }
 0x209   :  { %v1460_v9 = vpop.f32.mrb[5].mxu1  ;;  %v746_v10 = vsel %vm377_vm2, %v418_v8, -inf }
 0x20a   :  { %v421_v11 = vpop.f32.mrb[6].mxu1  ;;  %747 = vmax.xlane.f32.xlu0 %v746_v10 }
 0x20b   :  { %v1461_v12 = vpop.f32.mrb[7].mxu1 }
 0x27b   :  { %v464_v13 = vpop.f32.mrb[8].mxu0 }
 0x27c   :  { %v1466_v14 = vpop.f32.mrb[9].mxu0  ;;  %v749_v15 = vsel %vm377_vm2, %v464_v13, -inf }
 0x27d   :  { %750 = vmax.xlane.f32.xlu1 %v749_v15  ;;  %v467_v16 = vpop.f32.mrb[10].mxu0 }
 0x27e   :  { %v1467_v17 = vpop.f32.mrb[11].mxu0 }
 0x27f   :  { %v510_v18 = vpop.f32.mrb[8].mxu1 }
 0x280   :  { %v1472_v19 = vpop.f32.mrb[9].mxu1  ;;  %v752_v20 = vsel %vm377_vm2, %v510_v18, -inf }
 0x281   :  { %v513_v21 = vpop.f32.mrb[10].mxu1  ;;  %753 = vmax.xlane.f32.xlu0 %v752_v20 }
 0x282   :  { %v1473_v22 = vpop.f32.mrb[11].mxu1 }
 0x283   :  { %v556_v23 = vpop.f32.mrb[12].mxu0 }
 0x284   :  { %v1478_v24 = vpop.f32.mrb[13].mxu0  ;;  %v755_v25 = vsel %vm377_vm2, %v556_v23, -inf }
 0x285   :  { %756 = vmax.xlane.f32.xlu0 %v755_v25  ;;  %v559_v26 = vpop.f32.mrb[14].mxu0 }
 0x286   :  { %v1479_v27 = vpop.f32.mrb[15].mxu0 }
 0x287   :  { %v602_v28 = vpop.f32.mrb[12].mxu1 }
 0x288   :  { %v1484_v29 = vpop.f32.mrb[13].mxu1  ;;  %v758_v30 = vsel %vm377_vm2, %v602_v28, -inf }
 0x289   :  { %v605_v31 = vpop.f32.mrb[14].mxu1  ;;  %759 = vmax.xlane.f32.xlu1 %v758_v30 }
 0x28a   :  { %v1485_v32 = vpop.f32.mrb[15].mxu1 }
 0x28b   :  { %v648_v33 = vpop.f32.mrb[16].mxu0 }
 0x28c   :  { %v1490_v34 = vpop.f32.mrb[17].mxu0  ;;  %v761_v35 = vsel %vm377_vm2, %v648_v33, -inf }
 0x28d   :  { %762 = vmax.xlane.f32.xlu0 %v761_v35  ;;  %v651_v37 = vpop.f32.mrb[18].mxu0 }
 0x28e   :  { %v1491_v38 = vpop.f32.mrb[19].mxu0 }
 0x28f   :  { %v694_v39 = vpop.f32.mrb[16].mxu1 }
 0x290   :  { %v1496_v40 = vpop.f32.mrb[17].mxu1  ;;  %v764_v41 = vsel %vm377_vm2, %v694_v39, -inf }
 0x291   :  { %v697_v42 = vpop.f32.mrb[18].mxu1  ;;  %765 = vmax.xlane.f32.xlu1 %v764_v41 }
 0x292   :  { %v1497_v43 = vpop.f32.mrb[19].mxu1 }
 0x293   :  { %v740_v44 = vpop.f32.mrb[20].mxu0 }
 0x294   :  { %v1502_v45 = vpop.f32.mrb[21].mxu0  ;;  %v767_v46 = vsel %vm377_vm2, %v740_v44, -inf }
 0x295   :  { %768 = vmax.xlane.f32.xlu0 %v767_v46  ;;  %v743_v47 = vpop.f32.mrb[22].mxu0 }
 0x296   :  { %v1503_v48 = vpop.f32.mrb[23].mxu0 }
 0x297   :  { %v748_v49 = vpop.xlane.xlu0 %747 }
 0x298   :  { %v770_v50 = vsub.f32 %v418_v8, %v748_v49 }
 0x29a   :  { %v778_v51 = vmul.f32 1.442695, %v770_v50 }
 0x29c   :  { %1600 = vpow2.f32 %v778_v51 }
 0x2a2   :  { %350 = vrot.lane.b32.xlu1 %v1987_v60, %s1784_s5 }
 0x2a6   :  { %v2019_v52 = vpop.eup %1600 }
 0x2a7   :  { %v794_v53 = vsel %vm377_vm2, %v2019_v52, 0.0 }
 0x2c6   :  { %795 = vadd.xlane.f32.xlu1 %v794_v53 }
 0x30a   :  { %v751_v54 = vpop.xlane.xlu1 %750 }
 0x30b   :  { %v771_v55 = vsub.f32 %v464_v13, %v751_v54 }
 0x30d   :  { %v780_v56 = vmul.f32 1.442695, %v771_v55 }
 0x30e   :  { %v754_v57 = vpop.xlane.xlu0 %753 }
 0x30f   :  { %1602 = vpow2.f32 %v780_v56  ;;  %v772_v58 = vsub.f32 %v510_v18, %v754_v57 }
 0x311   :  { %v782_v59 = vmul.f32 1.442695, %v772_v58 }
 0x312   :  { %v757_v61 = vpop.xlane.xlu0 %756 }
 0x313   :  { %1604 = vpow2.f32 %v782_v59  ;;  %v773_v62 = vsub.f32 %v556_v23, %v757_v61 }
 0x315   :  { %v784_v63 = vmul.f32 1.442695, %v773_v62 }
 0x316   :  { %v760_v1 = vpop.xlane.xlu1 %759 }
 0x317   :  { %1606 = vpow2.f32 %v784_v63  ;;  %v774_v2 = vsub.f32 %v602_v28, %v760_v1 }
 0x319   :  { %v1603_v3 = vpop.eup %1602  ;;  %v786_v4 = vmul.f32 1.442695, %v774_v2 }
 0x31a   :  { %v763_v5 = vpop.xlane.xlu0 %762  ;;  %v797_v6 = vsel %vm377_vm2, %v1603_v3, 0.0 }
 0x31b   :  { %1608 = vpow2.f32 %v786_v4  ;;  %v775_v7 = vsub.f32 %v648_v33, %v763_v5  ;;  %798 = vadd.xlane.f32.xlu0 %v797_v6  ;;  %v373_v6 = vpack.c.bf16 %v1966_v36, %v1966_v36 }
 0x31d   :  { %v1605_v8 = vpop.eup %1604  ;;  %v788_v9 = vmul.f32 1.442695, %v775_v7 }
 0x31e   :  { %v766_v10 = vpop.xlane.xlu1 %765  ;;  %v800_v11 = vsel %vm377_vm2, %v1605_v8, 0.0 }
 0x31f   :  { %1610 = vpow2.f32 %v788_v9  ;;  %v776_v12 = vsub.f32 %v694_v39, %v766_v10  ;;  %801 = vadd.xlane.f32.xlu1 %v800_v11  ;;  %v1039_v10 = vsel %vm853_vm3, %v373_v6, 0 }
 0x321   :  { %v1607_v13 = vpop.eup %1606  ;;  %v790_v14 = vmul.f32 1.442695, %v776_v12 }
 0x322   :  { %v351_v15 = vpop.permute.xlu1 %350  ;;  %v769_v16 = vpop.xlane.xlu0 %768  ;;  %v803_v17 = vsel %vm377_vm2, %v1607_v13, 0.0 }
 0x323   :  { %1612 = vpow2.f32 %v790_v14  ;;  %v370_v18 = vpack.c.bf16 %v351_v15, %v351_v15  ;;  %v777_v19 = vsub.f32 %v740_v44, %v769_v16  ;;  %804 = vadd.xlane.f32.xlu0 %v803_v17 }
 0x325   :  { %v2026_v20 = vpop.eup %1608  ;;  %v901_v21 = vsel %vm853_vm3, %v370_v18, 0  ;;  %v792_v22 = vmul.f32 1.442695, %v777_v19 }
 0x326   :  { %1511 = vmatpush3.bf16.msra.mxu0 %v901_v21  ;;  %v806_v23 = vsel %vm377_vm2, %v2026_v20, 0.0 }
 0x327   :  { %1614 = vpow2.f32 %v792_v22  ;;  %807 = vadd.xlane.f32.xlu1 %v806_v23  ;;  %1522 = vmatprep.subr.bf16.mxu0 %v1782_v0 }
 0x329   :  { %v2032_v24 = vpop.eup %1610 }
 0x32a   :  { %v809_v25 = vsel %vm377_vm2, %v2032_v24, 0.0 }
 0x32b   :  { %810 = vadd.xlane.f32.xlu0 %v809_v25 }
 0x32d   :  { %v2036_v26 = vpop.eup %1612 }
 0x32e   :  { %v812_v27 = vsel %vm377_vm2, %v2036_v26, 0.0 }
 0x32f   :  { %813 = vadd.xlane.f32.xlu0 %v812_v27 }
 0x331   :  { %v2040_v28 = vpop.eup %1614 }
 0x332   :  { %v815_v29 = vsel %vm377_vm2, %v2040_v28, 0.0 }
 0x333   :  { %816 = vadd.xlane.f32.xlu0 %v815_v29 }
 0x338   :  { %356 = vrot.lane.b32.xlu1 %v1987_v60, %s1786_s4 }
 0x33c   :  { %360 = vrot.lane.b32.xlu1 %v1966_v36, %s1784_s5 }
 0x340   :  { %363 = vrot.lane.b32.xlu1 %v1966_v36, %s1785_s2 }
 0x344   :  { %366 = vrot.lane.b32.xlu1 %v1966_v36, %s1786_s4 }
 0x349   :  { %353 = vrot.lane.b32.xlu0 %v1987_v60, %s1785_s2 }
 0x353   :  { %v796_v30 = vpop.xlane.xlu1 %795 }
 0x354   :  { %1616 = vrcp.f32 %v796_v30 }
 0x35e   :  { %v1617_v31 = vpop.eup %1616 }
 0x35f   :  { %v826_v32 = vmul.f32 %v1617_v31, %v2019_v52 }
 0x361   :  { %834 = vst.msk [vmem:[#allocation11] sm:$0xff] %vm377_vm2, %v826_v32  ;;  %v842_v33 = vpack.c.bf16 %v826_v32, %v826_v32 }
 0x363   :  { %1507 = vmatmul.mubr.msk.bf16.vlgmr.msra.gmra.mrb[20].mxu1 %vm377_vm2, %v842_v33 }
 0x364   :  { %1518 = vmatprep.mubr.msk.bf16.mxu1 %vm1783_vm0, %v1782_v0 }
 0x3a8   :  { %v799_v34 = vpop.xlane.xlu0 %798 }
 0x3a9   :  { %1618 = vrcp.f32 %v799_v34 }
 0x3ac   :  { %v802_v35 = vpop.xlane.xlu1 %801 }
 0x3ad   :  { %1620 = vrcp.f32 %v802_v35 }
 0x3b0   :  { %v805_v37 = vpop.xlane.xlu0 %804 }
 0x3b1   :  { %1622 = vrcp.f32 %v805_v37 }
 0x3b3   :  { %v1619_v60 = vpop.eup %1618 }
 0x3b4   :  { %v827_v38 = vmul.f32 %v1619_v60, %v1603_v3  ;;  %v808_v39 = vpop.xlane.xlu1 %807 }
 0x3b5   :  { %1624 = vrcp.f32 %v808_v39 }
 0x3b6   :  { %835 = vst.msk [vmem:[#allocation11 + $0x8] sm:$0xff] %vm377_vm2, %v827_v38  ;;  %v843_v40 = vpack.c.bf16 %v827_v38, %v827_v38 }
 0x3b7   :  { %v1621_v41 = vpop.eup %1620 }
 0x3b8   :  { %v828_v42 = vmul.f32 %v1621_v41, %v1605_v8  ;;  %v357_v43 = vpop.permute.xlu1 %356  ;;  %1513 = vmatmul.mubr.msk.bf16.vlgmr.msra.gmra.mrb[24].mxu0 %vm377_vm2, %v843_v40  ;;  %v811_v44 = vpop.xlane.xlu0 %810 }
 0x3b9   :  { %v372_v45 = vpack.c.bf16 %v357_v43, %v357_v43  ;;  %1626 = vrcp.f32 %v811_v44  ;;  %1524 = vmatprep.mubr.msk.bf16.mxu0 %vm1783_vm0, %v1782_v0  ;;  %v1599_v44 = vld [vmem:[#allocation8 + $0x8] sm:$0xff]  }
 0x3ba   :  { %836 = vst.msk [vmem:[#allocation11 + $0x10] sm:$0xff] %vm377_vm2, %v828_v42  ;;  %v844_v8 = vpack.c.bf16 %v828_v42, %v828_v42 }
 0x3bb   :  { %v1623_v46 = vpop.eup %1622  ;;  %v993_v47 = vsel %vm853_vm3, %v372_v45, 0 }
 0x3bc   :  { %v829_v48 = vmul.f32 %v1623_v46, %v1607_v13  ;;  %v361_v49 = vpop.permute.xlu1 %360  ;;  %1523 = vmatpush3.bf16.msra.mxu0 %v993_v47  ;;  %v814_v50 = vpop.xlane.xlu0 %813 }
 0x3bd   :  { %v374_v51 = vpack.c.bf16 %v361_v49, %v361_v49  ;;  %1628 = vrcp.f32 %v814_v50  ;;  %1534 = vmatprep.subr.bf16.mxu0 %v1782_v0 }
 0x3be   :  { %837 = vst.msk [vmem:[#allocation11 + $0x18] sm:$0xff] %vm377_vm2, %v829_v48  ;;  %v845_v52 = vpack.c.bf16 %v829_v48, %v829_v48 }
 0x3bf   :  { %v1625_v53 = vpop.eup %1624  ;;  %v1085_v54 = vsel %vm853_vm3, %v374_v51, 0 }
 0x3c0   :  { %v830_v55 = vmul.f32 %v1625_v53, %v2026_v20  ;;  %v364_v56 = vpop.permute.xlu1 %363  ;;  %1525 = vmatmul.mubr.msk.bf16.vlgmr.msra.gmra.mrb[28].mxu0 %vm377_vm2, %v845_v52  ;;  %v817_v57 = vpop.xlane.xlu0 %816 }
 0x3c1   :  { %1535 = vmatpush3.bf16.msra.mxu0 %v1085_v54  ;;  %1630 = vrcp.f32 %v817_v57  ;;  %1536 = vmatprep.mubr.msk.bf16.mxu0 %vm1783_vm0, %v1782_v0  ;;  %v375_v12 = vpack.c.bf16 %v364_v56, %v364_v56 }
 0x3c2   :  { %838 = vst.msk [vmem:[#allocation11 + $0x20] sm:$0xff] %vm377_vm2, %v830_v55  ;;  %1546 = vmatprep.subr.bf16.mxu0 %v1782_v0  ;;  %v846_v13 = vpack.c.bf16 %v830_v55, %v830_v55 }
 0x3c3   :  { %v1627_v58 = vpop.eup %1626  ;;  %v1131_v14 = vsel %vm853_vm3, %v375_v12, 0 }
 0x3c4   :  { %v831_v59 = vmul.f32 %v1627_v58, %v2032_v24  ;;  %v367_v61 = vpop.permute.xlu1 %366  ;;  %v354_v62 = vpop.permute.xlu0 %353 }
 0x3c5   :  { %v376_v63 = vpack.c.bf16 %v367_v61, %v367_v61  ;;  %v371_v1 = vpack.c.bf16 %v354_v62, %v354_v62 }
 0x3c6   :  { %839 = vst.msk [vmem:[#allocation11 + $0x28] sm:$0xff] %vm377_vm2, %v831_v59  ;;  %v847_v2 = vpack.c.bf16 %v831_v59, %v831_v59 }
 0x3c7   :  { %v1629_v3 = vpop.eup %1628  ;;  %v1177_v4 = vsel %vm853_vm3, %v376_v63, 0  ;;  %v947_v5 = vsel %vm853_vm3, %v371_v1, 0 }
 0x3c8   :  { %v832_v7 = vmul.f32 %v1629_v3, %v2036_v26  ;;  %1517 = vmatpush3.bf16.msra.mxu1 %v947_v5  ;;  %1537 = vmatmul.mubr.msk.bf16.vlgmr.msra.gmra.mrb[32].mxu0 %vm377_vm2, %v847_v2 }
 0x3c9   :  { %1547 = vmatpush3.bf16.msra.mxu0 %v1177_v4  ;;  %1528 = vmatprep.subr.bf16.mxu1 %v1782_v0 }
 0x3ca   :  { %840 = vst.msk [vmem:[#allocation11 + $0x30] sm:$0xff] %vm377_vm2, %v832_v7  ;;  %1548 = vmatprep.mubr.msk.bf16.mxu0 %vm1783_vm0, %v1782_v0  ;;  %v848_v15 = vpack.c.bf16 %v832_v7, %v832_v7 }
 0x3cb   :  { %v1631_v9 = vpop.eup %1630  ;;  %1519 = vmatmul.mubr.msk.bf16.vlgmr.msra.gmra.mrb[24].mxu1 %vm377_vm2, %v844_v8 }
 0x3cc   :  { %v833_v36 = vmul.f32 %v1631_v9, %v2040_v28  ;;  %1529 = vmatpush3.bf16.msra.mxu1 %v1039_v10  ;;  %1530 = vmatprep.mubr.msk.bf16.mxu1 %vm1783_vm0, %v1782_v0  ;;  %v1598_v28 = vld [vmem:[#allocation8] sm:$0xff]  }
 0x3cd   :  { %1540 = vmatprep.subr.bf16.mxu1 %v1782_v0 }
 0x3ce   :  { %841 = vst.msk [vmem:[#allocation11 + $0x38] sm:$0xff] %vm377_vm2, %v833_v36  ;;  %v849_v11 = vpack.c.bf16 %v833_v36, %v833_v36 }
 0x3d0   :  { %1549 = vmatmul.mubr.msk.bf16.vlgmr.msra.gmra.mrb[36].mxu0 %vm377_vm2, %v849_v11 }
 0x3d3   :  { %1531 = vmatmul.mubr.msk.bf16.vlgmr.msra.gmra.mrb[28].mxu1 %vm377_vm2, %v846_v13 }
 0x3d4   :  { %1541 = vmatpush3.bf16.msra.mxu1 %v1131_v14  ;;  %1542 = vmatprep.mubr.msk.bf16.mxu1 %vm1783_vm0, %v1782_v0 }
 0x3d5   :  { %1552 = vmatprep.subr.bf16.mxu1 %v1782_v0 }
 0x3db   :  { %1543 = vmatmul.mubr.msk.bf16.vlgmr.msra.gmra.mrb[32].mxu1 %vm377_vm2, %v848_v15 }
 0x3dc   :  { %1556 = vmatprep.mubr.msk.bf16.mxu1 %vm1783_vm0, %v1782_v0  ;;  %1553 = vmatpush3.bf16.msra.mxu1 %v1598_v28 }
 0x3dd   :  { %1554 = vmatprep.subr.bf16.mxu1 %v1782_v0 }
 0x3e0   :  { %1555 = vmatpush3.bf16.msra.mxu1 %v1599_v44 }
 0x436   :  { %v891_v16 = vpop.f32.mrb[20].mxu1 }
 0x437   :  { %v1508_v17 = vpop.f32.mrb[21].mxu1 }
 0x438   :  { %v894_v18 = vpop.f32.mrb[22].mxu1 }
 0x439   :  { %v1509_v19 = vpop.f32.mrb[23].mxu1 }
 0x48b   :  { %v937_v20 = vpop.f32.mrb[24].mxu0 }
 0x48c   :  { %v1514_v21 = vpop.f32.mrb[25].mxu0 }
 0x48d   :  { %v940_v22 = vpop.f32.mrb[26].mxu0 }
 0x48e   :  { %v1515_v23 = vpop.f32.mrb[27].mxu0 }
 0x493   :  { %v1029_v24 = vpop.f32.mrb[28].mxu0 }
 0x494   :  { %v1526_v25 = vpop.f32.mrb[29].mxu0 }
 0x495   :  { %v1032_v26 = vpop.f32.mrb[30].mxu0 }
 0x496   :  { %v1527_v27 = vpop.f32.mrb[31].mxu0 }
 0x49b   :  { %v1121_v29 = vpop.f32.mrb[32].mxu0 }
 0x49c   :  { %v1577_v30 = vpack.i.bf16 %v1121_v29, %v937_v20  ;;  %v1538_v31 = vpop.f32.mrb[33].mxu0 }
 0x49d   :  { %v1124_v32 = vpop.f32.mrb[34].mxu0 }
 0x49e   :  { %v983_v33 = vpop.f32.mrb[24].mxu1  ;;  %1578 = vrot.lane.b32.xlu0 %v1577_v30, %s1779_s14  ;;  %v1539_v34 = vpop.f32.mrb[35].mxu0 }
 0x49f   :  { %v1520_v35 = vpop.f32.mrb[25].mxu1 }
 0x4a0   :  { %v986_v37 = vpop.f32.mrb[26].mxu1 }
 0x4a1   :  { %v1521_v60 = vpop.f32.mrb[27].mxu1 }
 0x4a3   :  { %v1213_v38 = vpop.f32.mrb[36].mxu0 }
 0x4a4   :  { %v1587_v39 = vpack.i.bf16 %v1213_v38, %v1029_v24  ;;  %v1550_v40 = vpop.f32.mrb[37].mxu0 }
 0x4a5   :  { %v1216_v41 = vpop.f32.mrb[38].mxu0 }
 0x4a6   :  { %v1075_v42 = vpop.f32.mrb[28].mxu1  ;;  %1588 = vrot.lane.b32.xlu0 %v1587_v39, %s1787_s6  ;;  %v1551_v43 = vpop.f32.mrb[39].mxu0 }
 0x4a7   :  { %v1532_v45 = vpop.f32.mrb[29].mxu1 }
 0x4a8   :  { %v1078_v46 = vpop.f32.mrb[30].mxu1 }
 0x4a9   :  { %v1533_v0 = vpop.f32.mrb[31].mxu1 }
 0x4ae   :  { %v1167_v47 = vpop.f32.mrb[32].mxu1 }
 0x4af   :  { %v1582_v48 = vpack.i.bf16 %v1167_v47, %v983_v33  ;;  %v1544_v49 = vpop.f32.mrb[33].mxu1 }
 0x4b0   :  { %v1170_v50 = vpop.f32.mrb[34].mxu1 }
 0x4b1   :  { %1583 = vrot.lane.b32.xlu1 %v1582_v48, %s1788_s28  ;;  %v1545_v51 = vpop.f32.mrb[35].mxu1 }
 0x510   :  { %v1579_v52 = vpop.permute.xlu0 %1578 }
 0x511   :  { %v1581_v53 = vunpack.i.h.bf16 %v1579_v52  ;;  %v1580_v54 = vunpack.i.l.bf16 %v1579_v52 }
 0x513   :  { %v1244_v59 = vsel %vm377_vm2, %v1075_v42, %v1581_v53  ;;  %v1243_v61 = vsel %vm377_vm2, %v891_v16, %v1580_v54 }
 0x518   :  { %v1589_v55 = vpop.permute.xlu0 %1588 }
 0x519   :  { %v1591_v62 = vunpack.i.h.bf16 %v1589_v55  ;;  %v1590_v63 = vunpack.i.l.bf16 %v1589_v55 }
 0x523   :  { %v1584_v56 = vpop.permute.xlu1 %1583 }
 0x524   :  { %v1586_v57 = vunpack.i.h.bf16 %v1584_v56  ;;  %v1585_v58 = vunpack.i.l.bf16 %v1584_v56 }
 0x526   :  { %v1246_v1 = vsel %vm1245_vm4, %v1243_v61, %v1585_v58  ;;  %v1247_v2 = vsel %vm1245_vm4, %v1244_v59, %v1586_v57 }
 0x527   :  { %v1249_v3 = vsel %vm1248_vm5, %v1246_v1, %v1590_v63  ;;  %v1250_v4 = vsel %vm1248_vm5, %v1247_v2, %v1591_v62 }
 0x528   :  { %v1251_v5 = vpack.c.bf16 %v1250_v4, %v1249_v3 }
 0x52a   :  { %1557 = vmatmul.mubr.msk.bf16.vlgmr.msra.gmra.mrb[36].mxu1 %vm118_vm1, %v1251_v5 }
 0x52b   :  { %1731 = shalt.err (!%p1728_p8)
}
 0x52c   :  { %s1732_s20 = scalar_lea.hbm %s2152_s10, 1024 }
 0x52d   :  { %p1733_p9 = scmp.ne.s32.totalorder %s2152_s10, %s1732_s20  ;;  %p1736_p10 = scmp.lt.u32.totalorder %s1732_s20, %s2152_s10 }
 0x52f   :  { %p1738_p11 = pnand %p1736_p10, %p1733_p9 }
 0x531   :  { %1741 = shalt.err (!%p1738_p11)
}
 0x532   :  { %1344 = dma.vmem_to_hbm [thread:$0]  %s1339_s16, 1024, %s2152_s10, [#allocation12], %s1778_s1, %s1778_s1, %s1779_s14  }
 0x533   :  { %v1384_v6 = vld [vmem:[%s2150_s8] ss:$0 sm:$0xff]  ;;  %s1790_s25 = smov [#allocation10]  }
 0x534   :  { %s1326_s29 = sshll.u32 %s1790_s25, 4  ;;  %s1327_s29 = int_to_ptr.vmem [resolvable:$true] %s1326_s29 }
 0x535   :  { %s1742_s30 = scalar_lea.vmem %s1327_s29, 256  ;;  %p1747_p13 = scmp.lt.s32.totalorder %s1327_s29, %s1327_s29 }
 0x536   :  { %p1743_p12 = scmp.ne.s32.totalorder %s1327_s29, %s1742_s30  ;;  %p1748_p0 = scmp.lt.s32.totalorder %s1742_s30, %s1742_s30 }
 0x538   :  { %p1749_p1 = por %p1748_p0, %p1747_p13 }
 0x53a   :  { %p1750_p2 = pnand %p1749_p1, %p1743_p12 }
 0x5fd   :  { %v1312_v7 = vpop.f32.mrb[36].mxu1 }
 0x5fe   :  { %v1313_v8 = vadd.f32 %v1384_v6, %v1312_v7  ;;  %v1558_v9 = vpop.f32.mrb[37].mxu1 }
 0x5ff   :  { %v1315_v10 = vpop.f32.mrb[38].mxu1 }
 0x600   :  { %1319 = vst.msk [vmem:[#allocation10] sm:$0xff] %vm118_vm1, %v1313_v8  ;;  %v1316_v36 = vadd.f32 %v1384_v6, %v1315_v10  ;;  %v1559_v11 = vpop.f32.mrb[39].mxu1 }
 0x602   :  { %1320 = vst.msk [vmem:[#allocation10 + $0x8] sm:$0xff] %vm118_vm1, %v1316_v36 }
 0x603   :  { %1753 = shalt.err (!%p1750_p2)
}
 0x604   :  { %s1754_s11 = scalar_lea.hbm %s2151_s9, 256 }
 0x605   :  { %p1755_p3 = scmp.ne.s32.totalorder %s2151_s9, %s1754_s11  ;;  %p1758_p4 = scmp.lt.u32.totalorder %s1754_s11, %s2151_s9 }
 0x607   :  { %p1760_p5 = pnand %p1758_p4, %p1755_p3 }
 0x609   :  { %1763 = shalt.err (!%p1760_p5)
}
 0x60a   :  { %1332 = dma.vmem_to_hbm [thread:$0]  %s1327_s29, 256, %s2151_s9, [#allocation4], %s1778_s1, %s1778_s1, %s1779_s14  }
 0x60b   :  { %1770 = dma.done.wait [#allocation4], 256  }
 0x60c   :  { %1771 = vsyncadd [#allocation4], 4294967040 }
 0x60d   :  { %1772 = dma.done.wait [#allocation12], 1024  }
 0x60e   :  { %1773 = vsyncadd [#allocation12], 4294966272 }
 0x60f   :  { %1351 = vsyncpa [#allocation3], 1 }
 0x610   :  { %1352 = vsyncpa [#allocation6], 1 }
 0x611   :  { %1353 = vsyncpa [#allocation9], 1 }
 0x612   :  { %1354 = vsyncpa [#allocation4], 1 }
 0x613   :  { %1355 = vsyncpa [#allocation12], 1 }

</bundles_post_ra>
